<compile_context>
chip_gen: v7x
topology: tpu7x:2x2x1
jax: 0.10.0
libtpu: 0.0.40
codegen_flags: <defaults>
</compile_context>

<pallas_src>
import numpy as np
import jax
import jax.numpy as jnp
from jax.experimental import pallas as pl
from jax.experimental.pallas import tpu as pltpu


# ---------------------------------------------------------------------------
# SAME-padding / pooling-matrix helpers (host side, numpy)
# ---------------------------------------------------------------------------
def _same_padding_1d(in_size, stride, ksize=3):
    """TF 'SAME' padding for a non-transposed pool (mirrors getSAMEPadding)."""
    out_size = -(-in_size // stride)                       # ceil(in / stride)
    pad_total = max(0, (out_size - 1) * stride + ksize - in_size)
    sym = pad_total // 2
    odd = pad_total % 2
    return out_size, sym, sym + odd                        # (out, pad_left, pad_right)


def _pooling_matrix(in_size, out_size, stride, ksize=3):
    """A[o, i] = 1 iff input index i lies inside the ksize window of output o
    (after SAME padding).  Padded zeros contribute 0; the AvgPool divisor is
    applied later in the kernel epilogue."""
    exp_out, pad_l, _ = _same_padding_1d(in_size, stride, ksize)
    if exp_out != out_size:
        raise ValueError(
            f"SAME pooling with stride {stride} maps {in_size} -> {exp_out}, "
            f"but the requested output size is {out_size}")
    a = np.zeros((out_size, in_size), np.float32)
    for o in range(out_size):
        start = o * stride - pad_l
        for d in range(ksize):
            i = start + d
            if 0 <= i < in_size:
                a[o, i] = 1.0
    return a


# ---------------------------------------------------------------------------
# Pallas kernels
# ---------------------------------------------------------------------------
def _pool_residual_kernel(y_ref, x_ref, a_ref, o_ref):
    """o = y + (1/9) * (x @ A) over a (tb*co)-row slab.

    y_ref / o_ref : (tb*co, Ho*Wo)
    x_ref         : (tb*co, Hi*Wi)
    a_ref         : (Hi*Wi, Ho*Wo)   0/1 SAME-window matrix (grid-resident)

    Channels are folded into the matmul M dimension, so this is one fused MXU
    matmul per grid step; the divisor and residual add happen on the matmul
    result in registers and the output block is written with a single store
    (no scratch round trip, no per-channel slivers).  The block spans full
    rows, so the HBM writeback DMA is fully contiguous even when Ho*Wo < 128.
    """
    pooled = jnp.dot(x_ref[...], a_ref[...], preferred_element_type=jnp.float32)
    o_ref[...] = (pooled * (1.0 / 9.0)
                  + y_ref[...].astype(jnp.float32)).astype(o_ref.dtype)


def _add_residual_kernel(y_ref, x_ref, o_ref):
    """o = y + x (identical spatial dims), maximally lane-dense 2-D slabs."""
    o_ref[...] = (y_ref[...].astype(jnp.float32)
                  + x_ref[...].astype(jnp.float32)).astype(o_ref.dtype)


# ---------------------------------------------------------------------------
# Wrapper: generation-aware tiling + BlockSpec plumbing
# ---------------------------------------------------------------------------
def _tpu_generation_info():
    """(vmem_capacity_bytes, tensorcores_per_chip) with conservative fallbacks."""
    vmem_cap, num_tc = 64 << 20, 1          # conservative defaults (v7x-sized VMEM)
    try:
        kind = jax.devices()[0].device_kind.lower()
    except Exception:
        kind = ""
    if "v7" in kind or "7x" in kind:
        vmem_cap, num_tc = 64 << 20, 2      # 64 MiB / TC, dual TensorCore
    elif "v5" in kind or "v6" in kind:
        vmem_cap, num_tc = 128 << 20, 1     # 128 MiB, single TensorCore
    try:                                    # refine if the runtime query exists
        info = pltpu.get_tpu_info()
        vmem_cap = int(getattr(info, "vmem_capacity_bytes", vmem_cap))
    except Exception:
        pass
    return vmem_cap, num_tc


def _pick_batch_tile(batch, rows_per_batch, bytes_per_batch, resident_bytes,
                     vmem_limit, num_tc):
    """Largest batch tile that (a) divides `batch`, (b) keeps the sublane rule
    on every block (tile*rows_per_batch % 8 == 0 or tile == batch), and
    (c) fits the VMEM budget counting DOUBLE-BUFFERED in/out blocks plus the
    grid-resident pooling matrix and compiler-scratch headroom.  On dual-TC
    parts prefer a tile that leaves >= 2 grid steps so "parallel" semantics
    can shard the batch axis across both TensorCores."""
    cands = [t for t in range(1, batch + 1)
             if batch % t == 0
             and (t == batch or (t * rows_per_batch) % 8 == 0)]
    budget = max(vmem_limit - resident_bytes - (2 << 20), 0)
    fits = [t for t in cands if 2 * t * bytes_per_batch <= budget]
    if not fits:
        # TODO(synk): nothing fits the VMEM budget; a second grid axis over
        # channel / output-row tiles would be needed to shrink further.
        return min(cands)
    best = max(fits)
    if num_tc >= 2 and batch // best < 2:
        halves = [t for t in fits if batch // t >= 2]
        if halves:
            best = max(halves)
    return best


def residual_connection_pallas(y, x, pool_mat, co):
    """y + residual(x): x is cropped to `co` channels and (optionally) SAME
    3x3 average-pooled via the dense 0/1 pooling matrix `pool_mat`
    ((Hi*Wi, Ho*Wo)); the 1/9 divisor is applied in the kernel epilogue."""
    b, ci, hi, wi = x.shape
    by, cy, ho, wo = y.shape
    assert by == b and cy == co

    # Channel crop (done once in the wrapper so the kernel sees uniform slabs).
    # TODO(synk): when co < ci and co % 8 == 0 this could be a 3-D
    # (tb, co, Hi*Wi) BlockSpec crop inside the kernel instead of a wrapper
    # slice, saving one HBM round trip of the kept channels.
    xc = x if co == ci else x[:, :co]

    vmem_cap, num_tc = _tpu_generation_info()
    vmem_limit = int(min((vmem_cap * 3) // 4, 100 << 20))   # 48 MiB v7x, 96 MiB v5e/v6e

    if pool_mat is not None:
        hiwi, howo = hi * wi, ho * wo
        a = pool_mat if pool_mat.dtype == x.dtype else pool_mat.astype(x.dtype)
        a_bytes = int(a.size) * a.dtype.itemsize

        # Free NCHW reshapes: channels fold into the matmul M dimension.
        x2 = xc.reshape(b * co, hiwi)
        y2 = y.reshape(b * co, howo)

        bytes_per_batch = co * (hiwi * x2.dtype.itemsize
                                + howo * y2.dtype.itemsize * 2)   # x + y + out
        tb = _pick_batch_tile(b, co, bytes_per_batch,
                              resident_bytes=2 * a_bytes,
                              vmem_limit=vmem_limit, num_tc=num_tc)
        tr = tb * co
        grid = (b // tb,)

        cost = pl.CostEstimate(
            flops=2 * b * co * hiwi * howo,
            transcendentals=0,
            bytes_accessed=int(x2.size) * x2.dtype.itemsize
                           + 2 * int(y2.size) * y2.dtype.itemsize
                           + a_bytes)

        out2d = pl.pallas_call(
            _pool_residual_kernel,
            out_shape=jax.ShapeDtypeStruct((b * co, howo), y.dtype),
            grid=grid,
            in_specs=[pl.BlockSpec((tr, howo), lambda i: (i, 0)),
                      pl.BlockSpec((tr, hiwi), lambda i: (i, 0)),
                      pl.BlockSpec((hiwi, howo), lambda i: (0, 0))],
            out_specs=pl.BlockSpec((tr, howo), lambda i: (i, 0)),
            compiler_params=pltpu.CompilerParams(
                dimension_semantics=("parallel",),
                vmem_limit_bytes=vmem_limit),
            cost_estimate=cost,
        )(y2, x2, a)
        return out2d.reshape(b, co, ho, wo)

    # Same spatial dims: plain residual add on maximally lane-dense slabs.
    width = co * hi * wi
    x2 = xc.reshape(b, width)
    y2 = y.reshape(b, width)
    bytes_per_batch = width * (x2.dtype.itemsize + 2 * y2.dtype.itemsize)
    tb = _pick_batch_tile(b, 1, bytes_per_batch, resident_bytes=0,
                          vmem_limit=vmem_limit, num_tc=num_tc)
    grid = (b // tb,)
    cost = pl.CostEstimate(flops=b * width, transcendentals=0,
                           bytes_accessed=b * bytes_per_batch)
    out2d = pl.pallas_call(
        _add_residual_kernel,
        out_shape=jax.ShapeDtypeStruct((b, width), y.dtype),
        grid=grid,
        in_specs=[pl.BlockSpec((tb, width), lambda i: (i, 0)),
                  pl.BlockSpec((tb, width), lambda i: (i, 0))],
        out_specs=pl.BlockSpec((tb, width), lambda i: (i, 0)),
        compiler_params=pltpu.CompilerParams(
            dimension_semantics=("parallel",),
            vmem_limit_bytes=vmem_limit),
        cost_estimate=cost,
    )(y2, x2)
    return out2d.reshape(b, co, ho, wo)


# ---------------------------------------------------------------------------
# Module
# ---------------------------------------------------------------------------
class ResidualConnection:
    """JAX/Pallas port of the PyTorch ResidualConnection (2-D image, NCHW)."""
    # TODO(synk): 1-D (text / AvgPool1d) branch of the PyTorch module not implemented.

    def __init__(self, input_shape, output_shape, residual=True):
        assert len(input_shape) == 4 and len(output_shape) == 4, "NCHW only"
        self.residual = bool(residual)
        self.input_shape = tuple(int(s) for s in input_shape)
        self.output_shape = tuple(int(s) for s in output_shape)
        ci, co = self.input_shape[1], self.output_shape[1]
        if self.residual and co > ci:
            # PyTorch module warns and disables the residual connection.
            self.residual = False
        self.co = min(ci, co)

        in_sp = list(self.input_shape[2:])
        out_sp = list(self.output_shape[2:])
        self.stride = (1, 1)
        self.pool_mat = None
        # NOTE: lexicographic spatial comparison mirrors the PyTorch module.
        if self.residual and out_sp < in_sp:
            for i_s, o_s in zip(in_sp, out_sp):
                if o_s <= 0 or i_s % o_s != 0:
                    raise ValueError(
                        f"spatial dims {in_sp} -> {out_sp} are not an integer "
                        "stride ratio; SAME avg-pool residual is undefined")
            self.stride = tuple(i // o for i, o in zip(in_sp, out_sp))
            ah = _pooling_matrix(in_sp[0], out_sp[0], self.stride[0])
            aw = _pooling_matrix(in_sp[1], out_sp[1], self.stride[1])
            # 0/1 window-membership matrix: pooled_flat = (x_flat @ A) * (1/9).
            # Keeping A at 0/1 (divisor applied in the kernel) makes it exact in
            # bf16, enabling the native low-precision MXU path for bf16 inputs.
            # TODO(synk): switch to a separable (Ah, Aw) two-stage pool when
            # Hi*Wi is large (dense kron A is O(Hi*Wi*Ho*Wo) VMEM and FLOPs).
            self.pool_mat = jnp.asarray(np.kron(ah, aw).T, dtype=jnp.float32)
        elif self.residual and out_sp > in_sp:
            # PyTorch module warns and disables the residual connection.
            self.residual = False

    def __call__(self, y, x):
        if not self.residual:
            return y
        return residual_connection_pallas(y, x, self.pool_mat, self.co)


# ---------------------------------------------------------------------------
# Pure-JAX reference matching the PyTorch semantics
# ---------------------------------------------------------------------------
def reference_forward(mod, y, x):
    xc = x[:, :mod.co]
    if mod.pool_mat is None:
        return y + xc
    sh, sw = mod.stride
    _, ph_l, ph_r = _same_padding_1d(x.shape[2], sh)
    _, pw_l, pw_r = _same_padding_1d(x.shape[3], sw)
    summed = jax.lax.reduce_window(
        xc, 0.0, jax.lax.add,
        window_dimensions=(1, 1, 3, 3),
        window_strides=(1, 1, sh, sw),
        padding=((0, 0), (0, 0), (ph_l, ph_r), (pw_l, pw_r)))
    return y + summed / 9.0


if __name__ == "__main__":
    key = jax.random.PRNGKey(0)
    kx1, ky1, kx2, ky2 = jax.random.split(key, 4)

    # Case 1: channel crop + SAME 3x3 avg-pool residual (spatial downsampling).
    in_shape = (2, 8, 16, 16)      # NCHW input of the residual branch (x)
    out_shape = (2, 4, 8, 8)       # module output y = f(x)
    x1 = jax.random.normal(kx1, in_shape, dtype=jnp.float32)
    y1 = jax.random.normal(ky1, out_shape, dtype=jnp.float32)
    mod1 = ResidualConnection(in_shape, out_shape, residual=True)
    o1 = jax.block_until_ready(mod1(y1, x1))
    r1 = reference_forward(mod1, y1, x1)
    np.testing.assert_allclose(np.asarray(o1), np.asarray(r1), rtol=1e-5, atol=1e-5)
    assert o1.shape == out_shape and o1.dtype == y1.dtype

    # Case 2: identical shapes -> plain lane-dense residual add (no pooling).
    shape2 = (2, 4, 16, 16)
    x2 = jax.random.normal(kx2, shape2, dtype=jnp.float32)
    y2 = jax.random.normal(ky2, shape2, dtype=jnp.float32)
    mod2 = ResidualConnection(shape2, shape2, residual=True)
    o2 = jax.block_until_ready(mod2(y2, x2))
    r2 = reference_forward(mod2, y2, x2)
    np.testing.assert_allclose(np.asarray(o2), np.asarray(r2), rtol=1e-5, atol=1e-5)

    print("KERNEL_OK")
</pallas_src>

<mosaic_0001>
module attributes {stable_mosaic.version = 11 : i64} {
  func.func @_pool_residual_kernel(%arg0: i32, %arg1: memref<8x64xf32, #tpu.memory_space<vmem>>, %arg2: memref<8x256xf32, #tpu.memory_space<vmem>>, %arg3: memref<256x64xf32, #tpu.memory_space<vmem>>, %arg4: memref<8x64xf32, #tpu.memory_space<vmem>>) attributes {dimension_semantics = [#tpu.dimension_semantics<parallel>], iteration_bounds = array<i64: 1>, scalar_prefetch = 0 : i64, scratch_operands = 0 : i64, tpu.core_type = #tpu.core_type<tc>, window_params = [{transform_indices = @transform_0, window_bounds = array<i64: 8, 64>}, {transform_indices = @transform_1, window_bounds = array<i64: 8, 256>}, {pipeline_mode = #tpu.pipeline_mode<synchronous>, transform_indices = @transform_2, window_bounds = array<i64: 256, 64>}, {transform_indices = @transform_3, window_bounds = array<i64: 8, 64>}]} {
    %c0 = arith.constant 0 : index
    %c0_0 = arith.constant 0 : index
    %0 = vector.load %arg2[%c0, %c0_0] : memref<8x256xf32, #tpu.memory_space<vmem>>, vector<8x256xf32>
    %c0_1 = arith.constant 0 : index
    %c0_2 = arith.constant 0 : index
    %1 = vector.load %arg3[%c0_1, %c0_2] : memref<256x64xf32, #tpu.memory_space<vmem>>, vector<256x64xf32>
    %cst = arith.constant dense<0.000000e+00> : vector<8x64xf32>
    %2 = tpu.matmul %0, %1, %cst {dimension_numbers = #tpu.dot_dimension_numbers<[1], [0], [0], [1], [0, 0, 1, 1], [], []>} : vector<8x256xf32>, vector<256x64xf32>, vector<8x64xf32> -> vector<8x64xf32>
    %cst_3 = arith.constant 0.111111112 : f32
    %3 = vector.broadcast %cst_3 : f32 to vector<8x64xf32>
    %4 = arith.mulf %2, %3 : vector<8x64xf32>
    %c0_4 = arith.constant 0 : index
    %c0_5 = arith.constant 0 : index
    %5 = vector.load %arg1[%c0_4, %c0_5] : memref<8x64xf32, #tpu.memory_space<vmem>>, vector<8x64xf32>
    %6 = arith.addf %4, %5 : vector<8x64xf32>
    %c0_6 = arith.constant 0 : index
    %c0_7 = arith.constant 0 : index
    %7 = vector.load %arg4[%c0_6, %c0_7] : memref<8x64xf32, #tpu.memory_space<vmem>>, vector<8x64xf32>
    tpu.vector_store %arg4[%c0_6, %c0_7], %6 {strides = array<i32>} : memref<8x64xf32, #tpu.memory_space<vmem>>, vector<8x64xf32>,
    return
  }
  func.func @transform_0(%arg0: i32) -> (i32, i32) {
    %c0_i32 = arith.constant 0 : i32
    %c0_i32_0 = arith.constant 0 : i32
    return %arg0, %c0_i32 : i32, i32
  }
  func.func @transform_1(%arg0: i32) -> (i32, i32) {
    %c0_i32 = arith.constant 0 : i32
    %c0_i32_0 = arith.constant 0 : i32
    return %arg0, %c0_i32 : i32, i32
  }
  func.func @transform_2(%arg0: i32) -> (i32, i32) {
    %c0_i32 = arith.constant 0 : i32
    %c0_i32_0 = arith.constant 0 : i32
    %c0_i32_1 = arith.constant 0 : i32
    return %c0_i32, %c0_i32_0 : i32, i32
  }
  func.func @transform_3(%arg0: i32) -> (i32, i32) {
    %c0_i32 = arith.constant 0 : i32
    %c0_i32_0 = arith.constant 0 : i32
    return %arg0, %c0_i32 : i32, i32
  }
}

</mosaic_0001>

<bundles_post_ra>
// kernel: tpu_custom_call.1
= control target key start
LH: loop header
LB: loop body
LE: loop exit
PB: predicated region body
PF: predicated region fallthrough
CT: control target
= control target key end

     0   :  { %s368_s0 = inlined_call_operand.vmem [shape: f32[8,64], index: 0, kind: input, shape index: {}]   ;;  %s369_s1 = inlined_call_operand.vmem [shape: f32[8,256], index: 1, kind: input, shape index: {}]   ;;  %s370_s2 = inlined_call_operand.vmem [shape: f32[256,64], index: 2, kind: input, shape index: {}]   ;;  %s371_s3 = inlined_call_operand.hbm [shape: f32[8,64], index: 3, kind: output, shape index: {}]  }
   0x1   :  { %v33_v0 = vld [vmem:[%s370_s2 + $0x80] sm:$0xff]  ;;  %v34_v1 = vld [vmem:[%s370_s2 + $0x88] sm:$0xff]  ;;  %v35_v5 = vld [vmem:[%s370_s2 + $0x90] sm:$0xff] }
   0x2   :  { %v17_v2 = vld [vmem:[%s370_s2] sm:$0xff]  ;;  %v173_v3 = vpack.c.bf16 %v34_v1, %v33_v0  ;;  %v18_v4 = vld [vmem:[%s370_s2 + $0x8] sm:$0xff]  ;;  %v36_v6 = vld [vmem:[%s370_s2 + $0x98] sm:$0xff] }
   0x3   :  { %v175_v7 = vpack.c.bf16 %v18_v4, %v17_v2  ;;  %v177_v8 = vpack.c.bf16 %v36_v6, %v35_v5  ;;  %v19_v9 = vld [vmem:[%s370_s2 + $0x10] sm:$0xff]  ;;  %v20_v10 = vld [vmem:[%s370_s2 + $0x18] sm:$0xff]  ;;  %v37_v11 = vld [vmem:[%s370_s2 + $0xa0] sm:$0xff] }
   0x4   :  { %174 = vmatprep.subr.bf16.mxu0 %v173_v3  ;;  %v38_v12 = vld [vmem:[%s370_s2 + $0xa8] sm:$0xff]  ;;  %v179_v13 = vpack.c.bf16 %v20_v10, %v19_v9  ;;  %v21_v15 = vld [vmem:[%s370_s2 + $0x20] sm:$0xff]  ;;  %v39_v17 = vld [vmem:[%s370_s2 + $0xb0] sm:$0xff] }
   0x5   :  { %176 = vmatpush3.bf16.msra.mxu0 %v175_v7  ;;  %v181_v14 = vpack.c.bf16 %v38_v12, %v37_v11  ;;  %v22_v16 = vld [vmem:[%s370_s2 + $0x28] sm:$0xff]  ;;  %v40_v18 = vld [vmem:[%s370_s2 + $0xb8] sm:$0xff]  ;;  %v23_v21 = vld [vmem:[%s370_s2 + $0x30] sm:$0xff] }
   0x6   :  { %178 = vmatprep.subr.bf16.mxu0 %v177_v8  ;;  %v183_v19 = vpack.c.bf16 %v22_v16, %v21_v15  ;;  %v185_v20 = vpack.c.bf16 %v40_v18, %v39_v17  ;;  %v24_v22 = vld [vmem:[%s370_s2 + $0x38] sm:$0xff]  ;;  %v41_v23 = vld [vmem:[%s370_s2 + $0xc0] sm:$0xff]  ;;  %v42_v24 = vld [vmem:[%s370_s2 + $0xc8] sm:$0xff] }
   0x7   :  { %v16_v25 = vld [vmem:[%s369_s1 + $0x8] sm:$0xff] }
   0x8   :  { %113 = vmatprep.mubr.f32.mxu0 %v16_v25 }
   0x9   :  { %180 = vmatpush3.bf16.msra.mxu0 %v179_v13 }
   0xa   :  { %182 = vmatprep.subr.bf16.mxu0 %v181_v14 }
   0xb   :  { %8 = vsyncpa [#allocation3], 0  ;;  %v187_v26 = vpack.c.bf16 %v24_v22, %v23_v21  ;;  %v189_v27 = vpack.c.bf16 %v42_v24, %v41_v23  ;;  %v25_v28 = vld [vmem:[%s370_s2 + $0x40] sm:$0xff]  ;;  %v26_v29 = vld [vmem:[%s370_s2 + $0x48] sm:$0xff]  ;;  %s230_s28 = smov [#allocation2]   ;;  %vm122_vm0 = vcmask 523264  }
   0xc   :  { %v43_v30 = vld [vmem:[%s370_s2 + $0xd0] sm:$0xff]  ;;  %v44_v31 = vld [vmem:[%s370_s2 + $0xd8] sm:$0xff]  ;;  %v191_v32 = vpack.c.bf16 %v26_v29, %v25_v28  ;;  %v45_v36 = vld [vmem:[%s370_s2 + $0xe0] sm:$0xff]  ;;  %s130_s29 = sshll.u32 %s230_s28, 4  ;;  %s131_s29 = int_to_ptr.vmem [resolvable:$true] %s130_s29 }
   0xd   :  { %184 = vmatpush3.bf16.msra.mxu0 %v183_v19  ;;  %v193_v33 = vpack.c.bf16 %v44_v31, %v43_v30  ;;  %v27_v34 = vld [vmem:[%s370_s2 + $0x50] sm:$0xff]  ;;  %v28_v35 = vld [vmem:[%s370_s2 + $0x58] sm:$0xff]  ;;  %v46_v37 = vld [vmem:[%s370_s2 + $0xe8] sm:$0xff]  ;;  %p211_p1 = scmp.lt.s32.totalorder %s131_s29, %s131_s29 }
   0xe   :  { %186 = vmatprep.subr.bf16.mxu0 %v185_v20  ;;  %v195_v38 = vpack.c.bf16 %v28_v35, %v27_v34  ;;  %v197_v39 = vpack.c.bf16 %v46_v37, %v45_v36  ;;  %v29_v40 = vld [vmem:[%s370_s2 + $0x60] sm:$0xff]  ;;  %v30_v41 = vld [vmem:[%s370_s2 + $0x68] sm:$0xff]  ;;  %v47_v42 = vld [vmem:[%s370_s2 + $0xf0] sm:$0xff] }
   0xf   :  { %v48_v43 = vld [vmem:[%s370_s2 + $0xf8] sm:$0xff]  ;;  %v199_v44 = vpack.c.bf16 %v30_v41, %v29_v40  ;;  %v31_v46 = vld [vmem:[%s370_s2 + $0x70] sm:$0xff]  ;;  %v15_v49 = vld [vmem:[%s369_s1] sm:$0xff] }
  0x10   :  { %v201_v45 = vpack.c.bf16 %v48_v43, %v47_v42  ;;  %v32_v47 = vld [vmem:[%s370_s2 + $0x78] sm:$0xff]  ;;  %v120_v53 = vld [vmem:[%s368_s0] sm:$0xff]  ;;  %s206_s2 = scalar_lea.vmem %s131_s29, 128 }
  0x11   :  { %188 = vmatpush3.bf16.msra.mxu0 %v187_v26  ;;  %v203_v48 = vpack.c.bf16 %v32_v47, %v31_v46  ;;  %p207_p0 = scmp.ne.s32.totalorder %s131_s29, %s206_s2  ;;  %p212_p2 = scmp.lt.s32.totalorder %s206_s2, %s206_s2 }
  0x12   :  { %190 = vmatprep.subr.bf16.mxu0 %v189_v27 }
  0x13   :  { %p213_p3 = por %p212_p2, %p211_p1 }
  0x15   :  { %192 = vmatpush3.bf16.msra.mxu0 %v191_v32  ;;  %p214_p4 = pnand %p213_p3, %p207_p0 }
  0x16   :  { %194 = vmatprep.subr.bf16.mxu0 %v193_v33 }
  0x19   :  { %196 = vmatpush3.bf16.msra.mxu0 %v195_v38 }
  0x1a   :  { %198 = vmatprep.subr.bf16.mxu0 %v197_v39 }
  0x1d   :  { %200 = vmatpush3.bf16.msra.mxu0 %v199_v44 }
  0x1e   :  { %202 = vmatprep.subr.bf16.mxu0 %v201_v45 }
  0x21   :  { %204 = vmatpush3.bf16.msra.mxu0 %v203_v48 }
  0x24   :  { %114 = vmatmul.mubr.f32.vlgmr.msra.gmra.mrb[0].mxu0 %v15_v49 }
  0xf7   :  { %v170_v50 = vpop.f32.mrb[0].mxu0 }
  0xf8   :  { %v171_v51 = vpop.f32.mrb[1].mxu0 }
  0xf9   :  { %v172_v52 = vadd.f32 %v171_v51, %v170_v50 }
  0xfb   :  { %v119_v54 = vmul.f32 0.11111111, %v172_v52 }
  0xfd   :  { %v121_v55 = vadd.f32 %v120_v53, %v119_v54 }
  0xff   :  { %123 = vst.msk [vmem:[#allocation2] sm:$0xff] %vm122_vm0, %v121_v55 }
 0x100   :  { %217 = shalt.err (!%p214_p4)
}
 0x101   :  { %s218_s4 = scalar_lea.hbm %s371_s3, 128 }
 0x102   :  { %p219_p5 = scmp.ne.s32.totalorder %s371_s3, %s218_s4  ;;  %p222_p6 = scmp.lt.u32.totalorder %s218_s4, %s371_s3 }
 0x104   :  { %p224_p7 = pnand %p222_p6, %p219_p5 }
 0x106   :  { %227 = shalt.err (!%p224_p7)
}
 0x107   :  { %133 = dma.vmem_to_hbm [thread:$0]  %s131_s29, 128, %s371_s3, [#allocation3]  }
 0x108   :  { %228 = dma.done.wait [#allocation3], 128  }
 0x109   :  { %229 = vsyncadd [#allocation3], 4294967168 }
 0x10a   :  { %137 = vsyncpa [#allocation3], 1 }

</bundles_post_ra>
